<compile_context>
chip_gen: v7x
topology: tpu7x:2x2x1
jax: 0.10.0
libtpu: 0.0.40
codegen_flags: <defaults>
</compile_context>

<pallas_src>
import functools
import math

import jax
import jax.numpy as jnp
from jax.experimental import pallas as pl
from jax.experimental.pallas import tpu as pltpu


def _msa_kernel(x_ref, wq_ref, bq_ref, wkvt_ref, bkv_ref, wp_ref, bp_ref,
                mask_ref, o_ref, *, num_heads, head_dim, compute_dtype):
    """One grid step == one batch element; all heads batched through the MXU."""
    H, Dh = num_heads, head_dim
    _, N, D = x_ref.shape

    x = x_ref[0]                                       # (N, D), f32
    xc = x.astype(compute_dtype)

    # ---- Q projection, batched over heads (scale folded into wq/bq). ----
    xb = jnp.broadcast_to(xc[None], (H, N, D))         # (H, N, D)
    q = jnp.einsum('hnc,hcd->hnd', xb, wq_ref[...],
                   preferred_element_type=jnp.float32)
    q = q + bq_ref[...]                                # (H, N, Dh), f32

    # ---- K / V projection in (head, head_dim, token) layout: one matmul. ----
    kvt = jnp.dot(wkvt_ref[...], x.T.astype(compute_dtype),
                  preferred_element_type=jnp.float32)  # (2D, N)
    kvt = kvt + bkv_ref[...]                           # broadcast (2D, 1) bias
    kvt = kvt.reshape(2, H, Dh, N)                     # pure major-dim split
    k_t = kvt[0]                                       # (H, Dh, N) == K^T per head
    v_t = kvt[1]                                       # (H, Dh, N) == V^T per head

    # ---- Attention logits + additive adjacency mask, f32 softmax. ----
    attn = jnp.einsum('hnd,hdm->hnm',
                      q.astype(compute_dtype), k_t.astype(compute_dtype),
                      preferred_element_type=jnp.float32)   # (H, N, N)
    attn = attn + mask_ref[...]
    m = jnp.max(attn, axis=-1, keepdims=True)
    e = jnp.exp(attn - m)
    s = jnp.sum(e, axis=-1, keepdims=True)
    p = e * pl.reciprocal(s, approx=True)

    # ---- Per-head context: (H, N, Dh). ----
    y = jnp.einsum('hnm,hem->hne',
                   p.astype(compute_dtype), v_t.astype(compute_dtype),
                   preferred_element_type=jnp.float32)

    # ---- Output projection with the head axis folded in (no concat). ----
    per_head = jnp.einsum('hnd,hdo->hno',
                          y.astype(compute_dtype), wp_ref[...],
                          preferred_element_type=jnp.float32)  # (H, N, D)
    out = jnp.sum(per_head, axis=0) + bp_ref[...]               # (N, D)
    o_ref[0] = out.astype(o_ref.dtype)


def msa_forward(x, w_qkv, b_qkv, w_proj, b_proj, adj_mask, *, num_heads,
                compute_dtype=jnp.bfloat16):
    """x: (B, N, D).  w_qkv: (D, 3D), b_qkv: (3D,), w_proj: (D, D),
    b_proj: (D,), adj_mask: (H, N, N) additive bias or None."""
    B, N, D = x.shape
    H = num_heads
    Dh = D // H
    scale = Dh ** (-0.5)

    if adj_mask is None:
        adj_mask = jnp.zeros((H, N, N), dtype=jnp.float32)

    # Wrapper-side (XLA) weight rearrangement -- free of in-kernel relayouts.
    # Per-head Q weights with the attention scale folded in.
    w_q = (w_qkv[:, :D] * scale).reshape(D, H, Dh).transpose(1, 0, 2)  # (H, D, Dh)
    b_q = (b_qkv[:D] * scale).reshape(H, 1, Dh)                        # (H, 1, Dh)
    # K/V weights transposed so the kernel produces (head, head_dim, token).
    w_kv_t = w_qkv[:, D:].T                                            # (2D, D)
    b_kv = b_qkv[D:].reshape(2 * D, 1)                                 # (2D, 1)
    # Output projection with the head axis split out (folds the head concat).
    w_p = w_proj.reshape(H, Dh, D)                                     # (H, Dh, D)
    b_p = b_proj.reshape(1, D)

    # bf16 MXU operands (halves weight DMA bytes); biases / softmax stay f32.
    w_q = w_q.astype(compute_dtype)
    w_kv_t = w_kv_t.astype(compute_dtype)
    w_p = w_p.astype(compute_dtype)

    kernel = functools.partial(_msa_kernel, num_heads=H, head_dim=Dh,
                               compute_dtype=compute_dtype)

    return pl.pallas_call(
        kernel,
        out_shape=jax.ShapeDtypeStruct((B, N, D), x.dtype),
        grid_spec=pltpu.PrefetchScalarGridSpec(
            num_scalar_prefetch=0,
            grid=(B,),
            in_specs=[
                pl.BlockSpec((1, N, D), lambda b: (b, 0, 0)),      # x
                pl.BlockSpec((H, D, Dh), lambda b: (0, 0, 0)),     # w_q (scaled)
                pl.BlockSpec((H, 1, Dh), lambda b: (0, 0, 0)),     # b_q (scaled)
                pl.BlockSpec((2 * D, D), lambda b: (0, 0)),        # w_kv^T
                pl.BlockSpec((2 * D, 1), lambda b: (0, 0)),        # b_kv column
                pl.BlockSpec((H, Dh, D), lambda b: (0, 0, 0)),     # w_proj per head
                pl.BlockSpec((1, D), lambda b: (0, 0)),            # b_proj row
                pl.BlockSpec((H, N, N), lambda b: (0, 0, 0)),      # adj_mask
            ],
            out_specs=pl.BlockSpec((1, N, D), lambda b: (b, 0, 0)),
        ),
        compiler_params=pltpu.CompilerParams(
            dimension_semantics=("parallel",)),
    )(x, w_q, b_q, w_kv_t, b_kv, w_p, b_p, adj_mask)


def msa_reference(x, w_qkv, b_qkv, w_proj, b_proj, adj_mask, *, num_heads):
    """Pure-JAX reference mirroring the PyTorch forward."""
    B, N, D = x.shape
    H = num_heads
    Dh = D // H
    scale = Dh ** (-0.5)
    qkv = x @ w_qkv + b_qkv                                     # (B, N, 3D)
    qkv = qkv.reshape(B, N, 3, H, Dh).transpose(2, 0, 3, 1, 4)  # (3, B, H, N, Dh)
    q, k, v = qkv[0], qkv[1], qkv[2]
    q = q * scale
    attn = jnp.einsum('bhnd,bhmd->bhnm', q, k)
    attn = attn + adj_mask[None]                                # broadcast over B
    attn = jax.nn.softmax(attn, axis=-1)
    y = jnp.einsum('bhnm,bhmd->bhnd', attn, v)
    y = y.transpose(0, 2, 1, 3).reshape(B, N, D)
    return y @ w_proj + b_proj


if __name__ == "__main__":
    # Small shapes consistent with the module: B=2, F_K (tokens)=8, ED (dim)=32,
    # num_heads=4 -> head_dim=8.
    B, N, D, H = 2, 8, 32, 4

    key = jax.random.PRNGKey(0)
    kx, kw1, kb1, kw2, kb2, km = jax.random.split(key, 6)

    x = jax.random.normal(kx, (B, N, D), dtype=jnp.float32)

    # Linear weights stored as (in, out) so y = x @ W + b (== torch x @ W.T).
    bound1 = 1.0 / math.sqrt(D)
    w_qkv = jax.random.uniform(kw1, (D, 3 * D), jnp.float32, -bound1, bound1)
    b_qkv = jax.random.uniform(kb1, (3 * D,), jnp.float32, -bound1, bound1)
    w_proj = jax.random.uniform(kw2, (D, D), jnp.float32, -bound1, bound1)
    b_proj = jax.random.uniform(kb2, (D,), jnp.float32, -bound1, bound1)

    # Additive adjacency mask (per head); zeros correspond to adj_mask=None.
    adj_mask = 0.1 * jax.random.normal(km, (H, N, N), dtype=jnp.float32)

    ref = msa_reference(x, w_qkv, b_qkv, w_proj, b_proj, adj_mask, num_heads=H)

    # f32 MXU path (tight check).
    out_f32 = msa_forward(x, w_qkv, b_qkv, w_proj, b_proj, adj_mask,
                          num_heads=H, compute_dtype=jnp.float32)
    out_f32 = jax.block_until_ready(out_f32)
    assert out_f32.shape == (B, N, D)
    assert jnp.allclose(out_f32, ref, atol=5e-3, rtol=5e-3), "f32 mismatch"

    # bf16 MXU operands (default, per perf review) -- looser tolerance.
    out_bf16 = msa_forward(x, w_qkv, b_qkv, w_proj, b_proj, adj_mask,
                           num_heads=H, compute_dtype=jnp.bfloat16)
    out_bf16 = jax.block_until_ready(out_bf16)
    assert out_bf16.shape == (B, N, D)
    assert jnp.allclose(out_bf16, ref, atol=5e-2, rtol=5e-2), "bf16 mismatch"

    print("KERNEL_OK")
</pallas_src>

<mosaic_0001>
module attributes {stable_mosaic.version = 11 : i64} {
  func.func @_msa_kernel(%arg0: i32, %arg1: memref<1x8x32xf32, #tpu.memory_space<vmem>>, %arg2: memref<4x32x8xf32, #tpu.memory_space<vmem>>, %arg3: memref<4x1x8xf32, #tpu.memory_space<vmem>>, %arg4: memref<64x32xf32, #tpu.memory_space<vmem>>, %arg5: memref<64x1xf32, #tpu.memory_space<vmem>>, %arg6: memref<4x8x32xf32, #tpu.memory_space<vmem>>, %arg7: memref<1x32xf32, #tpu.memory_space<vmem>>, %arg8: memref<4x8x8xf32, #tpu.memory_space<vmem>>, %arg9: memref<1x8x32xf32, #tpu.memory_space<vmem>>) attributes {dimension_semantics = [#tpu.dimension_semantics<parallel>], iteration_bounds = array<i64: 2>, scalar_prefetch = 0 : i64, scratch_operands = 0 : i64, tpu.core_type = #tpu.core_type<tc>, window_params = [{transform_indices = @transform_0, window_bounds = array<i64: 1, 8, 32>}, {pipeline_mode = #tpu.pipeline_mode<synchronous>, transform_indices = @transform_1, window_bounds = array<i64: 4, 32, 8>}, {pipeline_mode = #tpu.pipeline_mode<synchronous>, transform_indices = @transform_2, window_bounds = array<i64: 4, 1, 8>}, {pipeline_mode = #tpu.pipeline_mode<synchronous>, transform_indices = @transform_3, window_bounds = array<i64: 64, 32>}, {pipeline_mode = #tpu.pipeline_mode<synchronous>, transform_indices = @transform_4, window_bounds = array<i64: 64, 1>}, {pipeline_mode = #tpu.pipeline_mode<synchronous>, transform_indices = @transform_5, window_bounds = array<i64: 4, 8, 32>}, {pipeline_mode = #tpu.pipeline_mode<synchronous>, transform_indices = @transform_6, window_bounds = array<i64: 1, 32>}, {pipeline_mode = #tpu.pipeline_mode<synchronous>, transform_indices = @transform_7, window_bounds = array<i64: 4, 8, 8>}, {transform_indices = @transform_8, window_bounds = array<i64: 1, 8, 32>}]} {
    %c0 = arith.constant 0 : index
    %c0_0 = arith.constant 0 : index
    %c0_1 = arith.constant 0 : index
    %0 = vector.load %arg1[%c0, %c0_0, %c0_1] : memref<1x8x32xf32, #tpu.memory_space<vmem>>, vector<1x8x32xf32>
    %1 = vector.shape_cast %0 : vector<1x8x32xf32> to vector<8x32xf32>
    %2 = vector.shape_cast %1 : vector<8x32xf32> to vector<1x8x32xf32>
    %3 = vector.shape_cast %2 : vector<1x8x32xf32> to vector<1x8x32xf32>
    %4 = vector.broadcast %3 : vector<1x8x32xf32> to vector<4x8x32xf32>
    %c0_2 = arith.constant 0 : index
    %c0_3 = arith.constant 0 : index
    %c0_4 = arith.constant 0 : index
    %5 = vector.load %arg2[%c0_2, %c0_3, %c0_4] : memref<4x32x8xf32, #tpu.memory_space<vmem>>, vector<4x32x8xf32>
    "tpu.trace_start"() <{level = 10 : i32, message = "hnc,hcd->hnd"}> : () -> ()
    %cst = arith.constant dense<0.000000e+00> : vector<4x8x8xf32>
    %6 = tpu.matmul %4, %5, %cst {dimension_numbers = #tpu.dot_dimension_numbers<[2], [1], [1], [2], [0, 0, 0, 1, 1, 2], [0], [0]>} : vector<4x8x32xf32>, vector<4x32x8xf32>, vector<4x8x8xf32> -> vector<4x8x8xf32>
    "tpu.trace_stop"() : () -> ()
    %c0_5 = arith.constant 0 : index
    %c0_6 = arith.constant 0 : index
    %c0_7 = arith.constant 0 : index
    %7 = vector.load %arg3[%c0_5, %c0_6, %c0_7] : memref<4x1x8xf32, #tpu.memory_space<vmem>>, vector<4x1x8xf32>
    %8 = vector.broadcast %7 : vector<4x1x8xf32> to vector<4x8x8xf32>
    %9 = arith.addf %6, %8 : vector<4x8x8xf32>
    %c0_8 = arith.constant 0 : index
    %c0_9 = arith.constant 0 : index
    %10 = vector.load %arg4[%c0_8, %c0_9] : memref<64x32xf32, #tpu.memory_space<vmem>>, vector<64x32xf32>
    %11 = tpu.transpose %1, [1, 0] : vector<8x32xf32> -> vector<32x8xf32>
    %cst_10 = arith.constant dense<0.000000e+00> : vector<64x8xf32>
    %12 = tpu.matmul %10, %11, %cst_10 {dimension_numbers = #tpu.dot_dimension_numbers<[1], [0], [0], [1], [0, 0, 1, 1], [], []>} : vector<64x32xf32>, vector<32x8xf32>, vector<64x8xf32> -> vector<64x8xf32>
    %c0_11 = arith.constant 0 : index
    %c0_12 = arith.constant 0 : index
    %13 = vector.load %arg5[%c0_11, %c0_12] : memref<64x1xf32, #tpu.memory_space<vmem>>, vector<64x1xf32>
    %14 = vector.broadcast %13 : vector<64x1xf32> to vector<64x8xf32>
    %15 = arith.addf %12, %14 : vector<64x8xf32>
    %16 = vector.shape_cast %15 : vector<64x8xf32> to vector<2x4x8x8xf32>
    %17 = vector.extract_strided_slice %16 {offsets = [0, 0, 0, 0], sizes = [1, 4, 8, 8], strides = [1, 1, 1, 1]} : vector<2x4x8x8xf32> to vector<1x4x8x8xf32>
    %18 = vector.shape_cast %17 : vector<1x4x8x8xf32> to vector<4x8x8xf32>
    %19 = vector.extract_strided_slice %16 {offsets = [1, 0, 0, 0], sizes = [1, 4, 8, 8], strides = [1, 1, 1, 1]} : vector<2x4x8x8xf32> to vector<1x4x8x8xf32>
    %20 = vector.shape_cast %19 : vector<1x4x8x8xf32> to vector<4x8x8xf32>
    "tpu.trace_start"() <{level = 10 : i32, message = "hnd,hdm->hnm"}> : () -> ()
    %cst_13 = arith.constant dense<0.000000e+00> : vector<4x8x8xf32>
    %21 = tpu.matmul %9, %18, %cst_13 {dimension_numbers = #tpu.dot_dimension_numbers<[2], [1], [1], [2], [0, 0, 0, 1, 1, 2], [0], [0]>} : vector<4x8x8xf32>, vector<4x8x8xf32>, vector<4x8x8xf32> -> vector<4x8x8xf32>
    "tpu.trace_stop"() : () -> ()
    %c0_14 = arith.constant 0 : index
    %c0_15 = arith.constant 0 : index
    %c0_16 = arith.constant 0 : index
    %22 = vector.load %arg8[%c0_14, %c0_15, %c0_16] : memref<4x8x8xf32, #tpu.memory_space<vmem>>, vector<4x8x8xf32>
    %23 = arith.addf %21, %22 : vector<4x8x8xf32>
    %cst_17 = arith.constant dense<0xFF800000> : vector<4x8xf32>
    %24 = vector.multi_reduction <maximumf>, %23, %cst_17 [2] : vector<4x8x8xf32> to vector<4x8xf32>
    %25 = vector.shape_cast %24 : vector<4x8xf32> to vector<4x8x1xf32>
    %26 = vector.broadcast %25 : vector<4x8x1xf32> to vector<4x8x8xf32>
    %27 = arith.subf %23, %26 : vector<4x8x8xf32>
    %28 = math.exp %27 : vector<4x8x8xf32>
    %cst_18 = arith.constant dense<0.000000e+00> : vector<4x8xf32>
    %29 = vector.multi_reduction <add>, %28, %cst_18 [2] : vector<4x8x8xf32> to vector<4x8xf32>
    %30 = vector.shape_cast %29 : vector<4x8xf32> to vector<4x8x1xf32>
    %31 = tpu.reciprocal %30 {approx = true} : vector<4x8x1xf32> -> vector<4x8x1xf32>
    %32 = vector.broadcast %31 : vector<4x8x1xf32> to vector<4x8x8xf32>
    %33 = arith.mulf %28, %32 : vector<4x8x8xf32>
    "tpu.trace_start"() <{level = 10 : i32, message = "hnm,hem->hne"}> : () -> ()
    %cst_19 = arith.constant dense<0.000000e+00> : vector<4x8x8xf32>
    %34 = tpu.matmul %33, %20, %cst_19 {dimension_numbers = #tpu.dot_dimension_numbers<[2], [2], [1], [1], [0, 0, 0, 1, 1, 1], [0], [0]>} : vector<4x8x8xf32>, vector<4x8x8xf32>, vector<4x8x8xf32> -> vector<4x8x8xf32>
    "tpu.trace_stop"() : () -> ()
    %c0_20 = arith.constant 0 : index
    %c0_21 = arith.constant 0 : index
    %c0_22 = arith.constant 0 : index
    %35 = vector.load %arg6[%c0_20, %c0_21, %c0_22] : memref<4x8x32xf32, #tpu.memory_space<vmem>>, vector<4x8x32xf32>
    "tpu.trace_start"() <{level = 10 : i32, message = "hnd,hdo->hno"}> : () -> ()
    %cst_23 = arith.constant dense<0.000000e+00> : vector<4x8x32xf32>
    %36 = tpu.matmul %34, %35, %cst_23 {dimension_numbers = #tpu.dot_dimension_numbers<[2], [1], [1], [2], [0, 0, 0, 1, 1, 2], [0], [0]>} : vector<4x8x8xf32>, vector<4x8x32xf32>, vector<4x8x32xf32> -> vector<4x8x32xf32>
    "tpu.trace_stop"() : () -> ()
    %cst_24 = arith.constant dense<0.000000e+00> : vector<8x32xf32>
    %37 = vector.multi_reduction <add>, %36, %cst_24 [0] : vector<4x8x32xf32> to vector<8x32xf32>
    %c0_25 = arith.constant 0 : index
    %c0_26 = arith.constant 0 : index
    %38 = vector.load %arg7[%c0_25, %c0_26] : memref<1x32xf32, #tpu.memory_space<vmem>>, vector<1x32xf32>
    %39 = vector.broadcast %38 : vector<1x32xf32> to vector<8x32xf32>
    %40 = arith.addf %37, %39 : vector<8x32xf32>
    %c0_27 = arith.constant 0 : index
    %c0_28 = arith.constant 0 : index
    %c0_29 = arith.constant 0 : index
    %41 = vector.load %arg9[%c0_27, %c0_28, %c0_29] : memref<1x8x32xf32, #tpu.memory_space<vmem>>, vector<1x8x32xf32>
    %42 = vector.shape_cast %41 : vector<1x8x32xf32> to vector<8x32xf32>
    %43 = vector.shape_cast %40 : vector<8x32xf32> to vector<1x8x32xf32>
    tpu.vector_store %arg9[%c0_27, %c0_28, %c0_29], %43 {strides = array<i32>} : memref<1x8x32xf32, #tpu.memory_space<vmem>>, vector<1x8x32xf32>,
    return
  }
  func.func @transform_0(%arg0: i32) -> (i32, i32, i32) {
    %c0_i32 = arith.constant 0 : i32
    %c0_i32_0 = arith.constant 0 : i32
    %c0_i32_1 = arith.constant 0 : i32
    return %arg0, %c0_i32, %c0_i32_0 : i32, i32, i32
  }
  func.func @transform_1(%arg0: i32) -> (i32, i32, i32) {
    %c0_i32 = arith.constant 0 : i32
    %c0_i32_0 = arith.constant 0 : i32
    %c0_i32_1 = arith.constant 0 : i32
    %c0_i32_2 = arith.constant 0 : i32
    return %c0_i32, %c0_i32_0, %c0_i32_1 : i32, i32, i32
  }
  func.func @transform_2(%arg0: i32) -> (i32, i32, i32) {
    %c0_i32 = arith.constant 0 : i32
    %c0_i32_0 = arith.constant 0 : i32
    %c0_i32_1 = arith.constant 0 : i32
    %c0_i32_2 = arith.constant 0 : i32
    return %c0_i32, %c0_i32_0, %c0_i32_1 : i32, i32, i32
  }
  func.func @transform_3(%arg0: i32) -> (i32, i32) {
    %c0_i32 = arith.constant 0 : i32
    %c0_i32_0 = arith.constant 0 : i32
    %c0_i32_1 = arith.constant 0 : i32
    return %c0_i32, %c0_i32_0 : i32, i32
  }
  func.func @transform_4(%arg0: i32) -> (i32, i32) {
    %c0_i32 = arith.constant 0 : i32
    %c0_i32_0 = arith.constant 0 : i32
    %c0_i32_1 = arith.constant 0 : i32
    return %c0_i32, %c0_i32_0 : i32, i32
  }
  func.func @transform_5(%arg0: i32) -> (i32, i32, i32) {
    %c0_i32 = arith.constant 0 : i32
    %c0_i32_0 = arith.constant 0 : i32
    %c0_i32_1 = arith.constant 0 : i32
    %c0_i32_2 = arith.constant 0 : i32
    return %c0_i32, %c0_i32_0, %c0_i32_1 : i32, i32, i32
  }
  func.func @transform_6(%arg0: i32) -> (i32, i32) {
    %c0_i32 = arith.constant 0 : i32
    %c0_i32_0 = arith.constant 0 : i32
    %c0_i32_1 = arith.constant 0 : i32
    return %c0_i32, %c0_i32_0 : i32, i32
  }
  func.func @transform_7(%arg0: i32) -> (i32, i32, i32) {
    %c0_i32 = arith.constant 0 : i32
    %c0_i32_0 = arith.constant 0 : i32
    %c0_i32_1 = arith.constant 0 : i32
    %c0_i32_2 = arith.constant 0 : i32
    return %c0_i32, %c0_i32_0, %c0_i32_1 : i32, i32, i32
  }
  func.func @transform_8(%arg0: i32) -> (i32, i32, i32) {
    %c0_i32 = arith.constant 0 : i32
    %c0_i32_0 = arith.constant 0 : i32
    %c0_i32_1 = arith.constant 0 : i32
    return %arg0, %c0_i32, %c0_i32_0 : i32, i32, i32
  }
}

</mosaic_0001>

<bundles_post_ra>
// kernel: tpu_custom_call.1
= control target key start
LH: loop header
LB: loop body
LE: loop exit
PB: predicated region body
PF: predicated region fallthrough
CT: control target
= control target key end

     0   :  { %13 = vsyncpa [#allocation3], 0  ;;  %s2581_s0 = inlined_call_operand.vmem [shape: f32[2,8,32], index: 0, kind: input, shape index: {}]   ;;  %s2582_s1 = inlined_call_operand.vmem [shape: f32[4,32,8], index: 1, kind: input, shape index: {}]   ;;  %s2583_s2 = inlined_call_operand.vmem [shape: f32[4,1,8], index: 2, kind: input, shape index: {}]   ;;  %s2584_s3 = inlined_call_operand.vmem [shape: f32[64,32], index: 3, kind: input, shape index: {}]   ;;  %s2585_s4 = inlined_call_operand.vmem [shape: f32[64,1], index: 4, kind: input, shape index: {}]   ;;  %s2586_s5 = inlined_call_operand.vmem [shape: f32[4,8,32], index: 5, kind: input, shape index: {}]   ;;  %s2587_s6 = inlined_call_operand.vmem [shape: f32[1,32], index: 6, kind: input, shape index: {}]   ;;  %s2588_s7 = inlined_call_operand.vmem [shape: f32[4,8,8], index: 7, kind: input, shape index: {}]   ;;  %s2589_s8 = inlined_call_operand.hbm [shape: f32[2,8,32], index: 8, kind: output, shape index: {}]  }
   0x1   :  { %15 = vsyncpa [#allocation3 + $0x1], 0  ;;  %s2259_s27 = smov 0   ;;  %s2261_s28 = smov 0  }
   0x2   :  { %s2263_s29 = smov 0   ;;  %s2265_s30 = smov 0  }
   0x3 LB: > { %s2280_s9 = sadd.s32 4294967295, %s2207_s30   ;;  %s1845_s10 = sadd.s32 4294967294, %s2207_s30   ;;  %s2207_s30 = sphi %s2265_s30, %s2595_s30   ;;  %s2203_s29 = sphi %s2263_s29, %s2594_s29   ;;  %s2199_s28 = sphi %s2261_s28, %s2593_s28   ;;  %s2195_s27 = sphi %s2259_s27, %s2592_s27  }
   0x4   : > { %s2284_s11 = sadd.s32 1, %s2207_s30   ;;  %s201_s12 = sadd.s32 1, %s2203_s29 }
   0x5   : > { %s198_s13 = ssub.s32 %s2207_s30, %s2284_s11  ;;  %p211_p0 = scmp.ne.s32.totalorder %s2203_s29, %s2199_s28 }
   0x6   : > { %p199_p1 = scmp.eq.s32.totalorder %s198_s13, 0  ;;  %p212_p2 = scmp.eq.s32.totalorder %s2280_s9, 1 }
   0x7   : > { %p217_p3 = scmp.ne.s32.totalorder %s2199_s28, %s2195_s27  ;;  %p218_p4 = scmp.eq.s32.totalorder %s1845_s10, 1 }
   0x8   : > { %s2295_s14 = scalar_select %p199_p1, %s2203_s29, %s201_s12  }
   0x9   : > { %p2297_p5 = por %p212_p2, %p211_p0  ;;  %p2301_p6 = por %p218_p4, %p217_p3 }
   0xa   : > { %p1848_p7 = scmp.ge.s32.totalorder %s2207_s30, 1  ;;  %p264_p8 = scmp.lt.s32.totalorder %s2207_s30, 3 }
   0xc   : > { %p265_p9 = pnand %p1848_p7, %p264_p8 }
   0xd   : > { %v302_v0 = vld [vmem:[%s2582_s1] sm:$0xff] (!%p265_p9)  ;;  %v303_v1 = vld [vmem:[%s2582_s1 + $0x8] sm:$0xff] (!%p265_p9)  ;;  %v304_v2 = vld [vmem:[%s2582_s1 + $0x10] sm:$0xff] (!%p265_p9)  ;;  %v2209_v3 = vmov (!%p265_p9), 0.0|0.0   ;;  %vm2210_vm0 = vmmov (!%p265_p9), 0   ;;  %v2211_v6 = vmov (!%p265_p9), 0.0  }
   0xe   : > { %268 = sbr.rel (%p265_p9) target bundleno = 1246 (0x4de), region = 52  ;;  %2060 = vmatprep.subr.bf16.mxu0 (!%p265_p9), %v2209_v3  ;;  %v2061_v4 = vpack.c.bf16 (!%p265_p9), %v303_v1, %v302_v0  ;;  %v305_v5 = vld [vmem:[%s2582_s1 + $0x18] sm:$0xff] (!%p265_p9)  ;;  %1950 = vmatprep.mubr.msk.f32.mxu0 (!%p265_p9), %vm2210_vm0, %v2211_v6  ;;  %p297_p10 = scmp.lt.s32.totalorder (!%p265_p9), %s2280_s9, 1  ;;  %v306_v7 = vld [vmem:[%s2582_s1 + $0x20] sm:$0xff] (!%p265_p9)  ;;  %v307_v10 = vld [vmem:[%s2582_s1 + $0x28] sm:$0xff] (!%p265_p9)  ;;  %v2212_v11 = vmov (!%p265_p9), 0  }
   0xf   : > { %2066 = vmatprep.subr.bf16.mxu1 (!%p265_p9), %v2209_v3  ;;  %1961 = vmatprep.mubr.msk.f32.mxu1 (!%p265_p9), %vm2210_vm0, %v2211_v6  ;;  %v2064_v8 = vpack.c.bf16 (!%p265_p9), %v305_v5, %v304_v2  ;;  %v310_v9 = vld [vmem:[%s2582_s1 + $0x40] sm:$0xff] (!%p265_p9)  ;;  %v311_v12 = vld [vmem:[%s2582_s1 + $0x48] sm:$0xff] (!%p265_p9)  ;;  %v2067_v13 = vpack.c.bf16 (!%p265_p9), %v307_v10, %v306_v7  ;;  %v308_v14 = vld [vmem:[%s2582_s1 + $0x30] sm:$0xff] (!%p265_p9)  ;;  %vm346_vm1 = vcmask (!%p265_p9), 261120   ;;  %vm819_vm2 = vcmask (!%p265_p9), 64512   ;;  %s294_s20 = sand.u32 (!%p265_p9), 1, %s2199_s28  }
  0x10   : > { %2062 = vmatpush3.bf16.msra.mxu0 (!%p265_p9), %v2061_v4  ;;  %2127 = vset.pattern.permute.xlu0 (!%p265_p9), %v2212_v11  ;;  %v309_v15 = vld [vmem:[%s2582_s1 + $0x38] sm:$0xff] (!%p265_p9)  ;;  %v314_v17 = vld [vmem:[%s2582_s1 + $0x60] sm:$0xff] (!%p265_p9)  ;;  %v2073_v20 = vpack.c.bf16 (!%p265_p9), %v311_v12, %v310_v9  ;;  %v315_v21 = vld [vmem:[%s2582_s1 + $0x68] sm:$0xff] (!%p265_p9)  ;;  %s1886_s23 = sshll.u32 (!%p265_p9), %s2280_s9, 7  ;;  %s1773_s17 = scalar_lea.sflag (!%p265_p9), [#allocation3], %s294_s20 }
  0x11   : > { %2063 = vmatprep.subr.bf16.mxu0 (!%p265_p9), %v2209_v3  ;;  %2128 = vset.pattern.permute.xlu1 (!%p265_p9), %v2212_v11  ;;  %v2070_v16 = vpack.c.bf16 (!%p265_p9), %v309_v15, %v308_v14  ;;  %v638_v18 = vld [vmem:[%s2585_s4] sm:$0xff] (!%p265_p9)  ;;  %v640_v22 = vld [vmem:[%s2585_s4 + $0x10] sm:$0xff] (!%p265_p9)  ;;  %v313_v24 = vld [vmem:[%s2582_s1 + $0x58] sm:$0xff] (!%p265_p9)  ;;  %v2079_v25 = vpack.c.bf16 (!%p265_p9), %v315_v21, %v314_v17 }
  0x12   : > { %2068 = vmatpush3.bf16.msra.mxu1 (!%p265_p9), %v2067_v13  ;;  %v312_v23 = vld [vmem:[%s2582_s1 + $0x50] sm:$0xff] (!%p265_p9)  ;;  %648 = vperm.xlu0 (!%p265_p9), %2127, %v638_v18   ;;  %v639_v26 = vld [vmem:[%s2585_s4 + $0x8] sm:$0xff] (!%p265_p9)  ;;  %v317_v29 = vld [vmem:[%s2582_s1 + $0x78] sm:$0xff] (!%p265_p9) }
  0x13   : > { %2069 = vmatprep.subr.bf16.mxu1 (!%p265_p9), %v2209_v3  ;;  %658 = vperm.xlu1 (!%p265_p9), %2128, %v640_v22   ;;  %v2076_v27 = vpack.c.bf16 (!%p265_p9), %v313_v24, %v312_v23  ;;  %v316_v28 = vld [vmem:[%s2582_s1 + $0x70] sm:$0xff] (!%p265_p9)  ;;  %v641_v30 = vld [vmem:[%s2585_s4 + $0x18] sm:$0xff] (!%p265_p9)  ;;  %v630_v32 = vld [vmem:[%s2584_s3] sm:$0xff] (!%p265_p9) }
  0x14   : > { %2065 = vmatpush3.bf16.msra.mxu0 (!%p265_p9), %v2064_v8  ;;  %v2082_v31 = vpack.c.bf16 (!%p265_p9), %v317_v29, %v316_v28  ;;  %v631_v33 = vld [vmem:[%s2584_s3 + $0x8] sm:$0xff] (!%p265_p9)  ;;  %v632_v34 = vld [vmem:[%s2584_s3 + $0x10] sm:$0xff] (!%p265_p9)  ;;  %v633_v35 = vld [vmem:[%s2584_s3 + $0x18] sm:$0xff] (!%p265_p9) }
  0x15   : > { %s298_s10 = scalar_select %p297_p10, %s2280_s9, 1  ;;  %2072 = vmatprep.subr.bf16.mxu0 %v2209_v3  ;;  %v634_v36 = vld [vmem:[%s2584_s3 + $0x20] sm:$0xff]  ;;  %v635_v37 = vld [vmem:[%s2584_s3 + $0x28] sm:$0xff]  ;;  %v636_v2 = vld [vmem:[%s2584_s3 + $0x30] sm:$0xff] }
  0x16   : > { %2071 = vmatpush3.bf16.msra.mxu1 %v2070_v16  ;;  %653 = vperm.xlu0 %2127, %v639_v26   ;;  %v1851_v47 = vld [vmem:[%s2583_s2] ss:$0 sm:$0xff]  ;;  %v1852_v52 = vld [vmem:[%s2583_s2 + $0x1] ss:$0 sm:$0xff]  ;;  %v1853_v60 = vld [vmem:[%s2583_s2 + $0x2] ss:$0 sm:$0xff] }
  0x17   : > { %s1850_s25 = sshll.u32 %s298_s10, 3  ;;  %2078 = vmatprep.subr.bf16.mxu1 %v2209_v3  ;;  %663 = vperm.xlu1 %2128, %v641_v30   ;;  %v1854_v62 = vld [vmem:[%s2583_s2 + $0x3] ss:$0 sm:$0xff]  ;;  %v816_v9 = vld [vmem:[%s2588_s7 + $0x8] sm:$0xff]  ;;  %v817_v14 = vld [vmem:[%s2588_s7 + $0x10] sm:$0xff]  ;;  %s1849_s10 = sshll.u32 %s294_s20, 3 }
  0x18   : > { %s300_s13 = scalar_lea.vmem %s2581_s0, %s1850_s25  ;;  %v815_v4 = vld [vmem:[%s2588_s7] sm:$0xff]  ;;  %s296_s24 = scalar_lea.vmem [#allocation2], %s1849_s10 }
  0x19   : > { %v301_v19 = vld [vmem:[%s300_s13] sm:$0xff]  ;;  %s1786_s25 = sshll.u32 %s296_s24, 4  ;;  %s2538_s13 = scalar_lea.hbm %s2589_s8, %s1886_s23  ;;  %s2540_s25 = int_to_ptr.vmem [resolvable:$true] %s1786_s25 }
  0x1a   : > { %1951 = vmatmul.mubr.msk.f32.vlgmr.msra.gmra.mrb[0].mxu0 %vm346_vm1, %v301_v19  ;;  %1962 = vmatmul.mubr.msk.f32.vlgmr.msra.gmra.mrb[0].mxu1 %vm346_vm1, %v301_v19  ;;  %s2145_s18 = scalar_lea.vmem %s2540_s25, 128  ;;  %s2213_s9 = smov [#allocation2]  }
  0x1b   : > { %2074 = vmatpush3.bf16.msra.mxu0 %v2073_v20  ;;  %1972 = vmatprep.mubr.msk.f32.mxu0 %vm2210_vm0, %v2211_v6  ;;  %p2146_p11 = scmp.ne.s32.totalorder %s2540_s25, %s2145_s18  ;;  %s2149_s19 = sshll.u32 %s2213_s9, 4  ;;  %s2150_s19 = int_to_ptr.vmem [resolvable:$false] %s2149_s19 }
  0x1c   : > { %2075 = vmatprep.subr.bf16.mxu0 %v2209_v3  ;;  %2080 = vmatpush3.bf16.msra.mxu1 %v2079_v25  ;;  %v642_v25 = vld [vmem:[%s2585_s4 + $0x20] sm:$0xff]  ;;  %s2151_s10 = scalar_lea.vmem %s2150_s19, 256  ;;  %p2152_p0 = scmp.lt.s32.totalorder %s2540_s25, %s2150_s19 }
  0x1d   : > { %1983 = vmatprep.mubr.msk.f32.mxu1 %vm2210_vm0, %v2211_v6  ;;  %2081 = vmatprep.subr.bf16.mxu1 %v2209_v3  ;;  %v637_v3 = vld [vmem:[%s2584_s3 + $0x38] sm:$0xff]  ;;  %p2147_p12 = pnand %p2146_p11, %p2297_p5  ;;  %p2153_p1 = scmp.lt.s32.totalorder %s2151_s10, %s2145_s18 }
  0x1f   : > { %2077 = vmatpush3.bf16.msra.mxu0 %v2076_v27  ;;  %p2148_p13 = pneg %p2147_p12  ;;  %p2154_p2 = por %p2153_p1, %p2152_p0 }
  0x20   : > { %1986 = vmatprep.subr.msk.mxu0 %vm346_vm1, %v301_v19  ;;  %2083 = vmatpush3.bf16.msra.mxu1 %v2082_v31 }
  0x21   : > { %2000 = vmatprep.subr.mxu1 %v2211_v6  ;;  %p2155_p3 = pnand %p2154_p2, %p2148_p13 }
  0x22   : > { %1973 = vmatmul.mubr.msk.f32.vlgmr.msra.gmra.mrb[2].mxu0 %vm346_vm1, %v301_v19 }
  0x23   : > { %1988 = vmatprep.mubr.msk.f32.mxu0 %vm346_vm1, %v630_v32  ;;  %1984 = vmatmul.mubr.msk.f32.vlgmr.msra.gmra.mrb[2].mxu1 %vm346_vm1, %v301_v19 }
  0x24   : > { %2002 = vmatprep.mubr.msk.f32.mxu1 %vm2210_vm0, %v2211_v6 }
  0x28   : > { %1987 = vmatpush3.xpose.msk.msra.mxu0 %vm346_vm1, %v301_v19  ;;  %v818_v19 = vld [vmem:[%s2588_s7 + $0x18] sm:$0xff] }
  0x29   : > { %2020 = vmatprep.subr.mxu0 %v2211_v6 }
  0x2b   : > { %1989 = vmatmul.mubr.msk.f32.vlgmr.msra.gmra.mrb[4].mxu0 %vm346_vm1, %v631_v33 }
  0x2c   : > { %1991 = vmatprep.mubr.msk.f32.mxu0 %vm346_vm1, %v632_v34 }
  0x2f   : > { %1992 = vmatmul.mubr.msk.f32.gmra.mrb[6].mxu0 %vm346_vm1, %v633_v35 }
  0x30   : > { %1994 = vmatprep.mubr.msk.f32.mxu0 %vm346_vm1, %v634_v36 }
  0x33   : > { %1995 = vmatmul.mubr.msk.f32.gmra.mrb[8].mxu0 %vm346_vm1, %v635_v37 }
  0x34   : > { %1997 = vmatprep.mubr.msk.f32.mxu0 %vm346_vm1, %v636_v2 }
  0x37   : > { %1998 = vmatmul.mubr.msk.f32.gmra.mrb[10].mxu0 %vm346_vm1, %v637_v3 }
  0x38   : > { %2022 = vmatprep.mubr.msk.f32.mxu0 %vm2210_vm0, %v2211_v6 }
  0x91   : > { %v649_v45 = vpop.permute.xlu0 %648 }
  0x92   : > { %v659_v54 = vpop.permute.xlu1 %658 }
  0x95   : > { %v654_v49 = vpop.permute.xlu0 %653 }
  0x96   : > { %v664_v61 = vpop.permute.xlu1 %663 }
  0xed   : > { %v416_v38 = vpop.f32.mrb[0].mxu0  ;;  %v486_v40 = vpop.f32.mrb[0].mxu1 }
  0xee   : > { %v1952_v39 = vpop.f32.mrb[1].mxu0  ;;  %v1963_v41 = vpop.f32.mrb[1].mxu1  ;;  %v417_v53 = vadd.f32 %v1851_v47, %v416_v38  ;;  %v487_v57 = vadd.f32 %v1852_v52, %v486_v40  ;;  %v645_v52 = vld [vmem:[%s2585_s4 + $0x38] sm:$0xff] }
  0xf5   : > { %v556_v42 = vpop.f32.mrb[2].mxu0 }
  0xf6   : > { %v1974_v43 = vpop.f32.mrb[3].mxu0  ;;  %v626_v44 = vpop.f32.mrb[2].mxu1  ;;  %v557_v63 = vadd.f32 %v1853_v60, %v556_v42 }
  0xf7   : > { %v1985_v46 = vpop.f32.mrb[3].mxu1  ;;  %v627_v1 = vadd.f32 %v1854_v62, %v626_v44 }
  0xfe   : > { %v1990_v48 = vpop.f32.mrb[4].mxu0 }
  0xff   : > { %v776_v50 = vpop.f32.mrb[5].mxu0  ;;  %v782_v55 = vadd.f32 %v1990_v48, %v654_v49 }
 0x100   : > { %v777_v51 = vadd.f32 %v776_v50, %v649_v45  ;;  %v644_v50 = vld [vmem:[%s2585_s4 + $0x30] sm:$0xff] }
 0x102   : > { %2001 = vmatpush3.msra.mxu1 %v777_v51  ;;  %v1993_v56 = vpop.f32.mrb[6].mxu0 }
 0x103   : > { %2003 = vmatmul.mubr.msk.f32.vlgmr.msra.gmra.mrb[4].mxu1 %vm819_vm2, %v417_v53  ;;  %2005 = vmatprep.subr.mxu1 %v2211_v6  ;;  %v786_v58 = vpop.f32.mrb[7].mxu0  ;;  %v792_v0 = vadd.f32 %v1993_v56, %v664_v61 }
 0x104   : > { %2006 = vmatpush3.msra.mxu1 %v782_v55  ;;  %v787_v59 = vadd.f32 %v786_v58, %v659_v54  ;;  %2007 = vmatprep.mubr.msk.f32.mxu1 %vm2210_vm0, %v2211_v6  ;;  %v643_v54 = vld [vmem:[%s2585_s4 + $0x28] sm:$0xff] }
 0x105   : > { %2010 = vmatprep.subr.mxu1 %v2211_v6 }
 0x106   : > { %v1996_v26 = vpop.f32.mrb[8].mxu0 }
 0x107   : > { %2008 = vmatmul.mubr.msk.f32.vlgmr.msra.gmra.mrb[6].mxu1 %vm819_vm2, %v487_v57  ;;  %v796_v27 = vpop.f32.mrb[9].mxu0 }
 0x108   : > { %2011 = vmatpush3.msra.mxu1 %v787_v59  ;;  %2012 = vmatprep.mubr.msk.f32.mxu1 %vm2210_vm0, %v2211_v6 }
 0x109   : > { %2015 = vmatprep.subr.mxu1 %v2211_v6 }
 0x10a   : > { %v1999_v51 = vpop.f32.mrb[10].mxu0 }
 0x10b   : > { %2013 = vmatmul.mubr.msk.f32.vlgmr.msra.gmra.mrb[8].mxu1 %vm819_vm2, %v557_v63  ;;  %v806_v53 = vpop.f32.mrb[11].mxu0 }
 0x10c   : > { %2016 = vmatpush3.msra.mxu1 %v792_v0  ;;  %2017 = vmatprep.mubr.msk.f32.mxu1 %vm2210_vm0, %v2211_v6 }
 0x10d   : > { %2025 = vmatprep.subr.mxu1 %v2211_v6 }
 0x10f   : > { %2018 = vmatmul.mubr.msk.f32.vlgmr.msra.gmra.mrb[10].mxu1 %vm819_vm2, %v627_v1 }
 0x110   : > { %2027 = vmatprep.mubr.msk.f32.mxu1 %vm2210_vm0, %v2211_v6 }
 0x1d6   : > { %v889_v5 = vpop.f32.mrb[4].mxu1 }
 0x1d7   : > { %v890_v7 = vadd.f32 %v889_v5, %v815_v4  ;;  %v2004_v8 = vpop.f32.mrb[5].mxu1 }
 0x1d9   : > { %v1112_v10 = vsel %vm819_vm2, %v890_v7, -inf }
 0x1da   : > { %1113 = vmax.xlane.f32.xlu0 %v1112_v10  ;;  %v962_v11 = vpop.f32.mrb[6].mxu1  ;;  %v1460_v10 = vld [vmem:[%s2586_s5] sm:$0xff] }
 0x1db   : > { %v963_v12 = vadd.f32 %v962_v11, %v816_v9  ;;  %v2009_v13 = vpop.f32.mrb[7].mxu1  ;;  %v1461_v11 = vld [vmem:[%s2586_s5 + $0x8] sm:$0xff] }
 0x1dd   : > { %v1115_v15 = vsel %vm819_vm2, %v963_v12, -inf }
 0x1de   : > { %1116 = vmax.xlane.f32.xlu1 %v1115_v15  ;;  %v1035_v16 = vpop.f32.mrb[8].mxu1 }
 0x1df   : > { %v1036_v17 = vadd.f32 %v1035_v16, %v817_v14  ;;  %v2014_v18 = vpop.f32.mrb[9].mxu1 }
 0x1e1   : > { %v1118_v20 = vsel %vm819_vm2, %v1036_v17, -inf }
 0x1e2   : > { %1119 = vmax.xlane.f32.xlu0 %v1118_v20  ;;  %v1108_v21 = vpop.f32.mrb[10].mxu1 }
 0x1e3   : > { %v1109_v22 = vadd.f32 %v1108_v21, %v818_v19  ;;  %v2019_v23 = vpop.f32.mrb[11].mxu1 }
 0x1e5   : > { %v1121_v24 = vsel %vm819_vm2, %v1109_v22, -inf }
 0x1e6   : > { %1122 = vmax.xlane.f32.xlu0 %v1121_v24 }
 0x1ef   : > { %668 = vperm.xlu1 %2128, %v642_v25  }
 0x267   : > { %v1114_v28 = vpop.xlane.xlu0 %1113 }
 0x268   : > { %v1124_v29 = vsub.f32 %v890_v7, %v1114_v28 }
 0x26a   : > { %v1128_v30 = vmul.f32 1.442695, %v1124_v29 }
 0x26b   : > { %v1117_v31 = vpop.xlane.xlu1 %1116 }
 0x26c   : > { %2129 = vpow2.f32 %v1128_v30  ;;  %v1125_v32 = vsub.f32 %v963_v12, %v1117_v31  ;;  %v1462_v12 = vld [vmem:[%s2586_s5 + $0x10] sm:$0xff] }
 0x26e   : > { %v1130_v33 = vmul.f32 1.442695, %v1125_v32 }
 0x26f   : > { %v669_v34 = vpop.permute.xlu1 %668  ;;  %v1120_v35 = vpop.xlane.xlu0 %1119 }
 0x270   : > { %2131 = vpow2.f32 %v1130_v33  ;;  %v797_v36 = vadd.f32 %v796_v27, %v669_v34  ;;  %v1126_v37 = vsub.f32 %v1036_v17, %v1120_v35  ;;  %v1463_v17 = vld [vmem:[%s2586_s5 + $0x18] sm:$0xff]  ;;  %v1884_v34 = vld [vmem:[%s2587_s6] ss:$0 sm:$0xff] }
 0x272   : > { %v1132_v38 = vmul.f32 1.442695, %v1126_v37  ;;  %2021 = vmatpush3.xpose.msk.msra.mxu0 %vm819_vm2, %v797_v36 }
 0x273   : > { %v1123_v39 = vpop.xlane.xlu0 %1122  ;;  %2030 = vmatprep.subr.mxu0 %v2211_v6 }
 0x274   : > { %2133 = vpow2.f32 %v1132_v38  ;;  %v1127_v40 = vsub.f32 %v1109_v22, %v1123_v39 }
 0x276   : > { %v2130_v41 = vpop.eup %2129  ;;  %v1134_v42 = vmul.f32 1.442695, %v1127_v40 }
 0x277   : > { %v1136_v43 = vsel %vm819_vm2, %v2130_v41, 0.0 }
 0x278   : > { %2135 = vpow2.f32 %v1134_v42  ;;  %1137 = vadd.xlane.f32.xlu1 %v1136_v43 }
 0x27a   : > { %v2132_v44 = vpop.eup %2131 }
 0x27b   : > { %v1139_v45 = vsel %vm819_vm2, %v2132_v44, 0.0 }
 0x27c   : > { %1140 = vadd.xlane.f32.xlu0 %v1139_v45 }
 0x27e   : > { %v2134_v46 = vpop.eup %2133 }
 0x27f   : > { %v1142_v47 = vsel %vm819_vm2, %v2134_v46, 0.0 }
 0x280   : > { %1143 = vadd.xlane.f32.xlu1 %v1142_v47 }
 0x282   : > { %v2136_v48 = vpop.eup %2135 }
 0x283   : > { %v1145_v49 = vsel %vm819_vm2, %v2136_v48, 0.0 }
 0x284   : > { %1146 = vadd.xlane.f32.xlu0 %v1145_v49 }
 0x291   : > { %678 = vperm.xlu1 %2128, %v644_v50  }
 0x295   : > { %683 = vperm.xlu1 %2128, %v645_v52  }
 0x29a   : > { %673 = vperm.xlu0 %2127, %v643_v54  }
 0x305   : > { %v1138_v55 = vpop.xlane.xlu1 %1137 }
 0x306   : > { %2137 = vrcp.f32 %v1138_v55 }
 0x309   : > { %v1141_v56 = vpop.xlane.xlu0 %1140 }
 0x30d   : > { %v1144_v57 = vpop.xlane.xlu1 %1143 }
 0x30e   : > { %2139 = vrcp.f32 %v1144_v57 }
 0x30f   : > { %2141 = vrcp.f32 %v1141_v56 }
 0x310   : > { %v2138_v58 = vpop.eup %2137 }
 0x311   : > { %v1152_v59 = vmul.f32 %v2138_v58, %v2130_v41  ;;  %v679_v60 = vpop.permute.xlu1 %678  ;;  %v1147_v61 = vpop.xlane.xlu0 %1146 }
 0x312   : > { %v807_v62 = vadd.f32 %v806_v53, %v679_v60  ;;  %2143 = vrcp.f32 %v1147_v61 }
 0x313   : > { %2023 = vmatmul.mubr.msk.f32.vlgmr.msra.gmra.mrb[12].mxu0 %vm819_vm2, %v1152_v59 }
 0x314   : > { %2031 = vmatpush3.xpose.msk.msra.mxu0 %vm819_vm2, %v807_v62  ;;  %2032 = vmatprep.mubr.msk.f32.mxu0 %vm2210_vm0, %v2211_v6 }
 0x315   : > { %2040 = vmatprep.subr.mxu0 %v2211_v6  ;;  %v684_v4 = vpop.permute.xlu1 %683 }
 0x316   : > { %v812_v8 = vadd.f32 %v1999_v51, %v684_v4 }
 0x318   : > { %v2140_v63 = vpop.eup %2139 }
 0x319   : > { %v1154_v0 = vmul.f32 %v2140_v63, %v2134_v46  ;;  %v674_v1 = vpop.permute.xlu0 %673  ;;  %v2142_v2 = vpop.eup %2141 }
 0x31a   : > { %v802_v3 = vadd.f32 %v1996_v26, %v674_v1  ;;  %v1153_v5 = vmul.f32 %v2142_v2, %v2132_v44 }
 0x31b   : > { %2033 = vmatmul.mubr.msk.f32.vlgmr.msra.gmra.mrb[14].mxu0 %vm819_vm2, %v1154_v0 }
 0x31c   : > { %2026 = vmatpush3.xpose.msk.msra.mxu1 %vm819_vm2, %v802_v3  ;;  %2042 = vmatprep.mubr.msk.f32.mxu0 %vm2210_vm0, %v2211_v6  ;;  %v2144_v7 = vpop.eup %2143 }
 0x31d   : > { %2035 = vmatprep.subr.mxu1 %v2211_v6  ;;  %v1155_v9 = vmul.f32 %v2144_v7, %v2136_v48  ;;  %2041 = vmatpush3.msra.mxu0 %v1460_v10 }
 0x31e   : > { %2050 = vmatprep.subr.mxu0 %v2211_v6 }
 0x31f   : > { %2028 = vmatmul.mubr.msk.f32.vlgmr.msra.gmra.mrb[12].mxu1 %vm819_vm2, %v1153_v5 }
 0x320   : > { %2036 = vmatpush3.xpose.msk.msra.mxu1 %vm819_vm2, %v812_v8  ;;  %2037 = vmatprep.mubr.msk.f32.mxu1 %vm2210_vm0, %v2211_v6 }
 0x321   : > { %2045 = vmatprep.subr.mxu1 %v2211_v6 }
 0x323   : > { %2038 = vmatmul.mubr.msk.f32.vlgmr.msra.gmra.mrb[14].mxu1 %vm819_vm2, %v1155_v9 }
 0x324   : > { %2047 = vmatprep.mubr.msk.f32.mxu1 %vm2210_vm0, %v2211_v6  ;;  %2046 = vmatpush3.msra.mxu1 %v1461_v11 }
 0x325   : > { %2055 = vmatprep.subr.mxu1 %v2211_v6 }
 0x3e6   : > { %v1228_v13 = vpop.f32.mrb[12].mxu0 }
 0x3e7   : > { %v2024_v14 = vpop.f32.mrb[13].mxu0  ;;  %2043 = vmatmul.mubr.msk.f32.vlgmr.msra.gmra.mrb[16].mxu0 %vm819_vm2, %v1228_v13 }
 0x3e8   : > { %2051 = vmatpush3.msra.mxu0 %v1462_v12  ;;  %2052 = vmatprep.mubr.msk.f32.mxu0 %vm2210_vm0, %v2211_v6 }
 0x3ee   : > { %v1380_v15 = vpop.f32.mrb[14].mxu0 }
 0x3ef   : > { %v2034_v16 = vpop.f32.mrb[15].mxu0  ;;  %2053 = vmatmul.mubr.msk.f32.vlgmr.msra.gmra.mrb[18].mxu0 %vm819_vm2, %v1380_v15 }
 0x3f2   : > { %v1304_v18 = vpop.f32.mrb[12].mxu1 }
 0x3f3   : > { %v2029_v19 = vpop.f32.mrb[13].mxu1  ;;  %2048 = vmatmul.mubr.msk.f32.vlgmr.msra.gmra.mrb[16].mxu1 %vm819_vm2, %v1304_v18 }
 0x3f4   : > { %2056 = vmatpush3.msra.mxu1 %v1463_v17  ;;  %2057 = vmatprep.mubr.msk.f32.mxu1 %vm2210_vm0, %v2211_v6 }
 0x3f6   : > { %v1456_v20 = vpop.f32.mrb[14].mxu1 }
 0x3f7   : > { %v2039_v21 = vpop.f32.mrb[15].mxu1  ;;  %2058 = vmatmul.mubr.msk.f32.vlgmr.msra.gmra.mrb[18].mxu1 %vm819_vm2, %v1456_v20 }
 0x4ba   : > { %v1533_v22 = vpop.f32.mrb[16].mxu0 }
 0x4bb   : > { %v2044_v23 = vpop.f32.mrb[17].mxu0  ;;  %v1756_v27 = vsel %vm346_vm1, %v1533_v22, 0.0 }
 0x4c2   : > { %v1679_v24 = vpop.f32.mrb[18].mxu0 }
 0x4c3   : > { %v2054_v25 = vpop.f32.mrb[19].mxu0  ;;  %v1759_v6 = vsel %vm346_vm1, %v1679_v24, 0.0 }
 0x4c6   : > { %v1606_v26 = vpop.f32.mrb[16].mxu1 }
 0x4c7   : > { %v1757_v28 = vsel %vm346_vm1, %v1606_v26, 0.0  ;;  %v2049_v29 = vpop.f32.mrb[17].mxu1 }
 0x4c8   : > { %v1758_v30 = vadd.f32 %v1757_v28, %v1756_v27 }
 0x4ca   : > { %v1752_v31 = vpop.f32.mrb[18].mxu1  ;;  %v1760_v32 = vadd.f32 %v1759_v6, %v1758_v30 }
 0x4cb   : > { %v1761_v33 = vsel %vm346_vm1, %v1752_v31, 0.0  ;;  %v2059_v35 = vpop.f32.mrb[19].mxu1 }
 0x4cc   : > { %v1762_v36 = vadd.f32 %v1761_v33, %v1760_v32 }
 0x4ce   : > { %v1770_v37 = vadd.f32 %v1884_v34, %v1762_v36 }
 0x4d0   : > { %1771 = vst.msk [vmem:[%s296_s24] sm:$0xff] %vm346_vm1, %v1770_v37 }
 0x4d1   : > { %2158 = shalt.err (!%p2155_p3)
}
 0x4d2   : > { %s2159_s20 = scalar_lea.hbm %s2538_s13, 128  ;;  %s2163_s23 = scalar_lea.hbm %s2589_s8, 256 }
 0x4d3   : > { %p2160_p4 = scmp.ne.s32.totalorder %s2538_s13, %s2159_s20  ;;  %p2164_p9 = scmp.lt.u32.totalorder %s2538_s13, %s2589_s8 }
 0x4d4   : > { %p2165_p10 = scmp.lt.u32.totalorder %s2163_s23, %s2159_s20  ;;  %p2167_p12 = scmp.lt.u32.totalorder %s2159_s20, %s2538_s13 }
 0x4d5   : > { %p2161_p7 = pnand %p2160_p4, %p2297_p5 }
 0x4d6   : > { %p2166_p11 = por %p2165_p10, %p2164_p9 }
 0x4d7   : > { %p2162_p8 = pneg %p2161_p7 }
 0x4d8   : > { %p2168_p13 = por %p2167_p12, %p2166_p11 }
 0x4da   : > { %p2169_p0 = pnand %p2168_p13, %p2162_p8 }
 0x4dc   : > { %2172 = shalt.err (!%p2169_p0)
}
 0x4dd   : > { %2084 = dma.vmem_to_hbm [thread:$0]  (%p2297_p5), %s2540_s25, 128, %s2538_s13, %s1773_s17  }
 0x4de PF: > { %p2090_p1 = scmp.ge.s32.totalorder %s2207_s30, 2  ;;  %s1798_s12 = sand.u32 1, %s2195_s27  }
 0x4df   : > { %s1799_s18 = scalar_lea.sflag [#allocation3], %s1798_s12 }
 0x4e0   : > { %p2087_p2 = pnand %p2090_p1, %p2301_p6 }
 0x4e2   : > { %2190 = dma.done.wait (!%p2087_p2), %s1799_s18, 128  }
 0x4e3   : > { %2192 = vsyncadd (!%p2087_p2), %s1799_s18, 4294967168  ;;  %p18_p3 = scmp.ge.s32.totalorder %s2284_s11, 4   ;;  %s2592_s27 = smov %s2199_s28 }
 0x4e4   : > { %s2593_s28 = smov %s2203_s29  ;;  %s2594_s29 = smov %s2295_s14 }
 0x4e5   : > { %s2595_s30 = smov %s2284_s11  ;;  %20 = sbr.rel (!%p18_p3) target bundleno = 3 (0x3), region = 87 }
 0x4ec   :  { %1804 = vsyncpa [#allocation3], 1 }
 0x4ed   :  { %1806 = vsyncpa [#allocation3 + $0x1], 1 }

</bundles_post_ra>
